<compile_context>
chip_gen: v6e
topology: v6e:2x2x1
jax: 0.10.0
libtpu: 0.0.40
codegen_flags: <defaults>
</compile_context>

<pallas_src>
import functools

import jax
import jax.numpy as jnp
from jax.experimental import pallas as pl
from jax.experimental.pallas import tpu as pltpu

NEG_SLOPE = 0.01              # F.leaky_relu default negative_slope
NEG_INF = -1e30               # "-inf" sentinel for non-edges (bf16 representable)
NEG_EDGE_THRESH = -1e20       # adjmask > this  <=>  edge present
LANE = 128
COMPUTE_DTYPE = jnp.bfloat16  # MXU operand dtype (all matmuls accumulate in f32)
ADJMASK_DTYPE = jnp.bfloat16  # fused adjacency/mask HBM stream


def _default_exp_dtype():
    # bf16 exp roughly doubles EUP throughput on v6e/v7x; v5e and older have
    # no bf16 VPU/EUP path, so keep the softmax exponent in f32 there.
    try:
        kind = jax.devices()[0].device_kind.lower()
    except Exception:
        return jnp.bfloat16
    for tag in ("v2", "v3", "v4", "v5"):
        if tag in kind:
            return jnp.float32
    return jnp.bfloat16


EXP_DTYPE = _default_exp_dtype()


def _round_up(x, m):
    return (x + m - 1) // m * m


# --------------------------- generation-aware sizing --------------------------

def _vmem_capacity_bytes():
    try:
        cap = int(pltpu.get_tpu_info().vmem_capacity_bytes)
        if cap > 0:
            return cap
    except Exception:
        pass
    return 64 * 1024 * 1024            # conservative fallback (v7x per-core VMEM)


def _vmem_limit_bytes():
    cap = _vmem_capacity_bytes()
    # leave headroom for Mosaic internal scratch / compiler temporaries
    return min(int(cap * 0.875), cap - 2 * 1024 * 1024)


def _pick_row_tile(n, d_pad, vmem_limit):
    """Destination-row tile: largest multiple of 8 dividing N whose real
    footprint (resident z + s, double-buffered adj/mask tile, f32 score
    temporaries, output tiles) fits the scoped VMEM limit of this chip."""
    assert n % 8 == 0, "node count must be a multiple of 8 (pad the graph)"
    # resident across row tiles in the attention call (single-buffered):
    resident = n * d_pad * 2 + 8 * n * 4          # bf16 z + f32 s row (padded)
    headroom = 4 * 1024 * 1024
    budget = vmem_limit - resident - headroom
    # TODO(synk): switch to a flash-style source-chunked path when resident z
    # no longer fits (large-N contingency, mainly 64 MiB v7x).
    assert budget > 8 * 1024, "graph too large for the resident-z attention kernel"
    # per destination-row bytes while one tile is live:
    #   2x bf16 adjmask buffers + f32 am/scores temporaries + bf16 p
    #   + double-buffered f32 out / lane-padded d tiles
    per_row = n * (2 * 2 + 4 + 4 + 2) + 2 * (d_pad + 128) * 4
    tm = min(int(budget // per_row), 1024, n)
    tm = max(8, (tm // 8) * 8)
    while n % tm:
        tm -= 8
    return tm


_SINGLE_BUFFER_OK = None


def _single_buffer_ok():
    """Probe once whether pipeline_mode=pl.Buffered(1) lowers on this backend."""
    global _SINGLE_BUFFER_OK
    if _SINGLE_BUFFER_OK is None:
        def _copy(x_ref, o_ref):
            o_ref[...] = x_ref[...]
        try:
            x = jnp.zeros((8, 128), jnp.float32)
            y = pl.pallas_call(
                _copy,
                out_shape=jax.ShapeDtypeStruct((8, 128), jnp.float32),
                grid=(1,),
                in_specs=[pl.BlockSpec((8, 128), lambda i: (0, 0),
                                       pipeline_mode=pl.Buffered(1))],
                out_specs=pl.BlockSpec((8, 128), lambda i: (0, 0)),
            )(x)
            jax.block_until_ready(y)
            _SINGLE_BUFFER_OK = True
        except Exception:
            _SINGLE_BUFFER_OK = False
    return _SINGLE_BUFFER_OK


# ---------------------------------- kernels -----------------------------------

def _proj_kernel(h_ref, w_ref, z_ref, s_ref, d_ref, *, d_out, ones_col):
    # z_ext[tile] = h[tile] @ w_ext : ONE lane-dense MXU matmul (bf16 operands,
    # f32 accumulation) producing the projected features AND the per-node
    # attention terms (cols d_out / d_out+1 of w_ext hold W^T a_src / W^T a_dst).
    # The f32 accumulator is split here: z goes back to HBM already in bf16
    # (with the denominator ones-column set), s / d stay f32 for the softmax.
    res = jnp.dot(h_ref[...], w_ref[...], preferred_element_type=jnp.float32)
    s_ref[...] = res[:, d_out:d_out + 1]
    d_ref[...] = res[:, d_out + 1:d_out + 2]
    col = jax.lax.broadcasted_iota(jnp.int32, res.shape, 1)
    z_ref[...] = jnp.where(col == ones_col, 1.0, res).astype(z_ref.dtype)


def _attn_kernel(z_ref, s_ref, d_ref, am_ref, o_ref, *, ones_col):
    # One tile of destination-node rows.
    #   z_ref : (N, Dpad) bf16  projected features (+ ones column), resident
    #   s_ref : (1, N)    f32   source term  a_src . z[u]          , resident
    #   d_ref : (TM, 1)   f32   dest   term  a_dst . z[v]   (this tile)
    #   am_ref: (TM, N)   bf16  fused adjacency/mask (mask on edges, -1e30 off)
    am = am_ref[...].astype(jnp.float32)
    is_edge = am > NEG_EDGE_THRESH

    e = d_ref[...] + s_ref[...]                      # (TM, N) raw scores, f32
    e = jnp.where(e >= 0.0, e, NEG_SLOPE * e)        # leaky_relu
    scores = jnp.where(is_edge, e * am, NEG_INF)     # * train * fixed mask / -inf

    m = jnp.max(scores, axis=1, keepdims=True)       # row max (XLU), f32
    # exp underflows to exactly 0 for the -1e30 non-edge entries, so no second
    # select is needed; bf16 exponent on chips with a bf16 EUP (v6e/v7x).
    p = jnp.exp((scores - m).astype(EXP_DTYPE)).astype(COMPUTE_DTYPE)

    # aggregation; the ones-column of z makes column `ones_col` of acc the
    # softmax denominator (same bf16-rounded p as the numerator).
    acc = jnp.dot(p, z_ref[...], preferred_element_type=jnp.float32)
    denom = acc[:, ones_col:ones_col + 1]
    inv = pl.reciprocal(denom, approx=True)          # EUP slot
    inv = inv * (2.0 - denom * inv)                  # one Newton step -> f32 accuracy
    o_ref[...] = (acc * inv).astype(o_ref.dtype)


# ------------------------------- layer wrapper --------------------------------

def _build_w_ext(w_fc, a_vec, d_in_pad, d_pad):
    """Pack fc.weight and attn_fc.weight of one GATHeadLayer into a single
    lane-dense (d_in_pad, d_pad) matrix:
      cols [0, Dout) : W^T          (z = h @ W^T)
      col   Dout     : W^T a_src    (s = a_src . z)
      col   Dout + 1 : W^T a_dst    (d = a_dst . z)
      col   Dout + 2 : reserved for the ones/denominator column (set in-kernel)
      remaining cols / rows >= Din : 0
    """
    d_out, d_in = w_fc.shape
    w = jnp.asarray(w_fc, jnp.float32).T               # (Din, Dout)
    a = jnp.asarray(a_vec, jnp.float32)
    w_ext = jnp.zeros((d_in_pad, d_pad), jnp.float32)
    w_ext = w_ext.at[:d_in, :d_out].set(w)
    w_ext = w_ext.at[:d_in, d_out].set(w @ a[:d_out])
    w_ext = w_ext.at[:d_in, d_out + 1].set(w @ a[d_out:])
    return w_ext


def _gat_head_layer(h_c, w_c, d_out, adjmask, tm, vmem_limit, out_dtype,
                    single_buffer):
    """One GATHeadLayer (heads == 1) on lane-dense padded features.

    h_c    : (N, Din_p)  bf16   input features (layer 1 consumes layer 0's
                                bf16 output directly, no re-cast)
    w_c    : (Din_p, Dpad) bf16 packed [W^T | W^T a_src | W^T a_dst | 0...]
    adjmask: (N, N)      bf16   fused adjacency/mask (shared by both layers)
    returns (N, Dpad) `out_dtype`; columns >= d_out are scratch and are killed
    by the next layer's zero weight rows / the final output slice.
    """
    n, d_in = h_c.shape
    d_pad = w_c.shape[1]
    ones_col = d_out + 2
    grid = (n // tm,)
    cparams = pltpu.CompilerParams(
        dimension_semantics=("parallel",),
        vmem_limit_bytes=vmem_limit,
    )

    if single_buffer:
        def _res_spec(shape):   # constant-index residents: one buffer is enough
            return pl.BlockSpec(shape, lambda i: (0, 0),
                                pipeline_mode=pl.Buffered(1))
    else:
        def _res_spec(shape):
            return pl.BlockSpec(shape, lambda i: (0, 0))

    # --- projection: z, s, d from ONE matmul, row-tiled ----------------------
    z_bf, s_col, d_col = pl.pallas_call(
        functools.partial(_proj_kernel, d_out=d_out, ones_col=ones_col),
        out_shape=(jax.ShapeDtypeStruct((n, d_pad), COMPUTE_DTYPE),
                   jax.ShapeDtypeStruct((n, 1), jnp.float32),
                   jax.ShapeDtypeStruct((n, 1), jnp.float32)),
        grid=grid,
        in_specs=[pl.BlockSpec((tm, d_in), lambda i: (i, 0)),
                  _res_spec((d_in, d_pad))],                    # w_ext, resident
        out_specs=(pl.BlockSpec((tm, d_pad), lambda i: (i, 0)),
                   pl.BlockSpec((tm, 1), lambda i: (i, 0)),
                   pl.BlockSpec((tm, 1), lambda i: (i, 0))),
        compiler_params=cparams,
    )(h_c, w_c)

    # s as a lane-dense (1, N) row for the attention kernel: one tiny XLA
    # transpose of N floats per layer (the row layout cannot be emitted by the
    # row-tiled proj kernel unless TM is a multiple of 128).
    s_row = jnp.transpose(s_col)

    # --- attention + aggregation, tiled over destination-node rows -----------
    out = pl.pallas_call(
        functools.partial(_attn_kernel, ones_col=ones_col),
        out_shape=jax.ShapeDtypeStruct((n, d_pad), out_dtype),
        grid=grid,
        in_specs=[_res_spec((n, d_pad)),                        # z, resident
                  _res_spec((1, n)),                            # s row, resident
                  pl.BlockSpec((tm, 1), lambda i: (i, 0)),      # d, per row tile
                  pl.BlockSpec((tm, n), lambda i: (i, 0))],     # adjmask tile
        out_specs=pl.BlockSpec((tm, d_pad), lambda i: (i, 0)),
        compiler_params=cparams,
    )(z_bf, s_row, d_col, adjmask)
    return out


# -------------------------------- full forward --------------------------------

def gatnet_forward(params, h, adj, edge_mask, *, row_tile=None):
    """GATNet.forward: h is (1, N, in_dim); returns (1, N, out_dim) f32."""
    h_c = jnp.squeeze(h, axis=0).astype(COMPUTE_DTYPE)          # h.squeeze()
    n, in_dim = h_c.shape
    hidden = params["l0_fc_w"].shape[0]
    out_dim = params["l1_fc_w"].shape[0]

    # fused adjacency/mask, built ONCE (bf16) and shared by both layers:
    #   adjmask[v, u] = (train_mask * fixed_mask)[v, u]   if edge u -> v
    #                 = -1e30                              otherwise
    # NOTE: sentinel encoding requires every real mask value to be finite and
    # > NEG_EDGE_THRESH (true for any reasonable finite mask).
    adjmask = jnp.where(adj > 0.0, edge_mask, NEG_INF).astype(ADJMASK_DTYPE)

    d_pad0 = _round_up(hidden + 3, LANE)     # Dout + s + d + ones columns
    d_pad1 = _round_up(out_dim + 3, LANE)
    w_ext0 = _build_w_ext(params["l0_fc_w"], params["l0_attn_w"],
                          in_dim, d_pad0).astype(COMPUTE_DTYPE)
    w_ext1 = _build_w_ext(params["l1_fc_w"], params["l1_attn_w"],
                          d_pad0, d_pad1).astype(COMPUTE_DTYPE)

    vmem_limit = _vmem_limit_bytes()
    if row_tile is None:
        tm = _pick_row_tile(n, max(d_pad0, d_pad1), vmem_limit)
    else:
        assert row_tile % 8 == 0 and n % row_tile == 0
        tm = row_tile
    single_buffer = _single_buffer_ok()

    # TODO(synk): dispatch to a fused single-pallas_call path here for graphs
    # small enough that the whole problem fits VMEM (launch/HBM overhead
    # dominates at tiny N).
    # layer 0: GATLayer(in_dim, hidden, heads=1) -> bf16 (feeds layer 1 directly)
    h0 = _gat_head_layer(h_c, w_ext0, hidden, adjmask, tm, vmem_limit,
                         COMPUTE_DTYPE, single_buffer)
    # layer 1: GATLayer(hidden, out_dim, heads=1); scratch columns of h0 are
    # multiplied by zero rows of w_ext1, so they never leak through.
    h1 = _gat_head_layer(h0, w_ext1, out_dim, adjmask, tm, vmem_limit,
                         jnp.float32, single_buffer)
    return h1[:, :out_dim][None, ...]                            # h.unsqueeze(0)


# ------------------------ parameter init (deterministic) ----------------------

def xavier_uniform(key, shape):
    fan_out, fan_in = shape
    bound = jnp.sqrt(6.0 / (fan_in + fan_out))
    return jax.random.uniform(key, shape, jnp.float32, -bound, bound)


def init_gatnet_params(key, in_dim, hidden_dim, out_dim):
    k0, k1, k2, k3 = jax.random.split(key, 4)
    return {
        "l0_fc_w":   xavier_uniform(k0, (hidden_dim, in_dim)),    # fc.weight
        "l0_attn_w": xavier_uniform(k1, (1, 2 * hidden_dim))[0],  # attn_fc.weight
        "l1_fc_w":   xavier_uniform(k2, (out_dim, hidden_dim)),
        "l1_attn_w": xavier_uniform(k3, (1, 2 * out_dim))[0],
    }


# ------------------------------ pure-JAX references ---------------------------

def _ref_head(h, w_fc, a_vec, adj, edge_mask):
    # exact PyTorch-semantics head (f32 throughout)
    d_out = w_fc.shape[0]
    z = h @ w_fc.T
    s = z @ a_vec[:d_out]
    d = z @ a_vec[d_out:]
    e = d[:, None] + s[None, :]
    e = jnp.where(e >= 0, e, NEG_SLOPE * e) * edge_mask
    scores = jnp.where(adj > 0, e, NEG_INF)
    m = scores.max(axis=1, keepdims=True)
    p = jnp.where(adj > 0, jnp.exp(scores - m), 0.0)
    alpha = p / p.sum(axis=1, keepdims=True)
    return alpha @ z


def ref_forward(params, h, adj, edge_mask):
    h2d = jnp.squeeze(h, axis=0)
    h2d = _ref_head(h2d, params["l0_fc_w"], params["l0_attn_w"], adj, edge_mask)
    h2d = _ref_head(h2d, params["l1_fc_w"], params["l1_attn_w"], adj, edge_mask)
    return h2d[None, ...]


def _ref_head_matched(h_c, w_c, d_out, adjmask, out_dtype):
    # plain-JAX head mirroring the Pallas dtype / padding strategy exactly
    ones_col = d_out + 2
    z = jnp.dot(h_c, w_c, preferred_element_type=jnp.float32)
    col = jnp.arange(z.shape[1])[None, :]
    z = jnp.where(col == ones_col, 1.0, z)
    s = z[:, d_out][None, :]
    d = z[:, d_out + 1][:, None]
    z_bf = z.astype(COMPUTE_DTYPE)
    am = adjmask.astype(jnp.float32)
    is_edge = am > NEG_EDGE_THRESH
    e = d + s
    e = jnp.where(e >= 0.0, e, NEG_SLOPE * e)
    scores = jnp.where(is_edge, e * am, NEG_INF)
    m = scores.max(axis=1, keepdims=True)
    p = jnp.exp((scores - m).astype(EXP_DTYPE)).astype(COMPUTE_DTYPE)
    acc = jnp.dot(p, z_bf, preferred_element_type=jnp.float32)
    denom = acc[:, ones_col:ones_col + 1]
    return (acc / denom).astype(out_dtype)


def ref_forward_matched(params, h, adj, edge_mask):
    h_c = jnp.squeeze(h, axis=0).astype(COMPUTE_DTYPE)
    n, in_dim = h_c.shape
    hidden = params["l0_fc_w"].shape[0]
    out_dim = params["l1_fc_w"].shape[0]
    adjmask = jnp.where(adj > 0.0, edge_mask, NEG_INF).astype(ADJMASK_DTYPE)
    d_pad0 = _round_up(hidden + 3, LANE)
    d_pad1 = _round_up(out_dim + 3, LANE)
    w0 = _build_w_ext(params["l0_fc_w"], params["l0_attn_w"],
                      in_dim, d_pad0).astype(COMPUTE_DTYPE)
    w1 = _build_w_ext(params["l1_fc_w"], params["l1_attn_w"],
                      d_pad0, d_pad1).astype(COMPUTE_DTYPE)
    h0 = _ref_head_matched(h_c, w0, hidden, adjmask, COMPUTE_DTYPE)
    h1 = _ref_head_matched(h0, w1, out_dim, adjmask, jnp.float32)
    return h1[:, :out_dim][None, ...]


# ------------------------------------ main -------------------------------------

def _checks(out, params, h, adj, edge_mask, out_dim, n):
    assert out.shape == (1, n, out_dim), out.shape
    assert not bool(jnp.any(jnp.isnan(out))), "NaN in kernel output"
    # 1) tight check of the Pallas logic against a dtype-matched JAX reference
    exp_matched = ref_forward_matched(params, h, adj, edge_mask)
    assert jnp.allclose(out, exp_matched, atol=3e-2, rtol=3e-2), \
        "mismatch vs dtype-matched reference"
    # 2) end-to-end faithfulness to the f32 PyTorch-semantics reference
    expected = ref_forward(params, h, adj, edge_mask)
    drift = float(jnp.max(jnp.abs(out - expected)) /
                  (jnp.max(jnp.abs(expected)) + 1e-6))
    assert drift < 0.15, f"bf16 drift vs f32 reference too large: {drift}"


if __name__ == "__main__":
    key = jax.random.PRNGKey(0)
    k_feat, k_param, k_feat2, k_adj2, k_mask2 = jax.random.split(key, 5)

    IN_DIM, HIDDEN, OUT_DIM = 32, 16, 8        # net_params = [in, hidden, out]
    params = init_gatnet_params(k_param, IN_DIM, HIDDEN, OUT_DIM)

    # --- config A: tiny graph (single row tile) -------------------------------
    N = 16
    adj = jnp.zeros((N, N), jnp.float32)
    src = jnp.arange(N)
    adj = adj.at[(src + 1) % N, src].set(1.0)     # ring edges u -> u+1
    adj = adj.at[src, src].set(1.0)               # self loops
    edge_mask = jnp.ones((N, N), jnp.float32)     # adj_mask1_train * adj_mask2_fixed
    h = jax.random.normal(k_feat, (1, N, IN_DIM), jnp.float32)

    out = jax.block_until_ready(gatnet_forward(params, h, adj, edge_mask))
    _checks(out, params, h, adj, edge_mask, OUT_DIM, N)

    # --- config B: larger graph exercising the multi-step row-tiled grid ------
    N2 = 256
    src2 = jnp.arange(N2)
    rand_edges = (jax.random.uniform(k_adj2, (N2, N2)) < 0.05).astype(jnp.float32)
    adj2 = rand_edges.at[(src2 + 1) % N2, src2].set(1.0).at[src2, src2].set(1.0)
    edge_mask2 = jax.random.uniform(k_mask2, (N2, N2), jnp.float32, 0.5, 1.5)
    h2 = jax.random.normal(k_feat2, (1, N2, IN_DIM), jnp.float32)

    out2 = jax.block_until_ready(
        gatnet_forward(params, h2, adj2, edge_mask2, row_tile=64))
    _checks(out2, params, h2, adj2, edge_mask2, OUT_DIM, N2)

    print("KERNEL_OK")
</pallas_src>

<mosaic_0001>
module attributes {stable_mosaic.version = 11 : i64} {
  func.func @_copy(%arg0: i32, %arg1: memref<8x128xf32, #tpu.memory_space<vmem>>, %arg2: memref<8x128xf32, #tpu.memory_space<vmem>>) attributes {dimension_semantics = [#tpu.dimension_semantics<arbitrary>], iteration_bounds = array<i64: 1>, scalar_prefetch = 0 : i64, scratch_operands = 0 : i64, tpu.core_type = #tpu.core_type<tc>, window_params = [{pipeline_mode = #tpu.pipeline_mode<synchronous>, transform_indices = @transform_0, window_bounds = array<i64: 8, 128>}, {pipeline_mode = #tpu.pipeline_mode<synchronous>, transform_indices = @transform_1, window_bounds = array<i64: 8, 128>}]} {
    %c0 = arith.constant 0 : index
    %c0_0 = arith.constant 0 : index
    %0 = vector.load %arg1[%c0, %c0_0] : memref<8x128xf32, #tpu.memory_space<vmem>>, vector<8x128xf32>
    %c0_1 = arith.constant 0 : index
    %c0_2 = arith.constant 0 : index
    %1 = vector.load %arg2[%c0_1, %c0_2] : memref<8x128xf32, #tpu.memory_space<vmem>>, vector<8x128xf32>
    tpu.vector_store %arg2[%c0_1, %c0_2], %0 {strides = array<i32>} : memref<8x128xf32, #tpu.memory_space<vmem>>, vector<8x128xf32>,
    return
  }
  func.func @transform_0(%arg0: i32) -> (i32, i32) {
    %c0_i32 = arith.constant 0 : i32
    %c0_i32_0 = arith.constant 0 : i32
    %c0_i32_1 = arith.constant 0 : i32
    return %c0_i32, %c0_i32_0 : i32, i32
  }
  func.func @transform_1(%arg0: i32) -> (i32, i32) {
    %c0_i32 = arith.constant 0 : i32
    %c0_i32_0 = arith.constant 0 : i32
    %c0_i32_1 = arith.constant 0 : i32
    return %c0_i32, %c0_i32_0 : i32, i32
  }
}

module attributes {stable_mosaic.version = 11 : i64} {
  func.func @_proj_kernel(%arg0: i32, %arg1: memref<16x32xbf16, #tpu.memory_space<vmem>>, %arg2: memref<32x128xbf16, #tpu.memory_space<vmem>>, %arg3: memref<16x128xbf16, #tpu.memory_space<vmem>>, %arg4: memref<16x1xf32, #tpu.memory_space<vmem>>, %arg5: memref<16x1xf32, #tpu.memory_space<vmem>>) attributes {dimension_semantics = [#tpu.dimension_semantics<parallel>], iteration_bounds = array<i64: 1>, scalar_prefetch = 0 : i64, scratch_operands = 0 : i64, tpu.core_type = #tpu.core_type<tc>, window_params = [{transform_indices = @transform_0, window_bounds = array<i64: 16, 32>}, {pipeline_mode = #tpu.pipeline_mode<synchronous>, transform_indices = @transform_1, window_bounds = array<i64: 32, 128>}, {transform_indices = @transform_2, window_bounds = array<i64: 16, 128>}, {transform_indices = @transform_3, window_bounds = array<i64: 16, 1>}, {transform_indices = @transform_4, window_bounds = array<i64: 16, 1>}]} {
    %c0 = arith.constant 0 : index
    %c0_0 = arith.constant 0 : index
    %0 = vector.load %arg1[%c0, %c0_0] : memref<16x32xbf16, #tpu.memory_space<vmem>>, vector<16x32xbf16>
    %c0_1 = arith.constant 0 : index
    %c0_2 = arith.constant 0 : index
    %1 = vector.load %arg2[%c0_1, %c0_2] : memref<32x128xbf16, #tpu.memory_space<vmem>>, vector<32x128xbf16>
    %cst = arith.constant dense<0.000000e+00> : vector<16x128xf32>
    %2 = tpu.matmul %0, %1, %cst {dimension_numbers = #tpu.dot_dimension_numbers<[1], [0], [0], [1], [0, 0, 1, 1], [], []>} : vector<16x32xbf16>, vector<32x128xbf16>, vector<16x128xf32> -> vector<16x128xf32>
    %3 = vector.extract_strided_slice %2 {offsets = [0, 16], sizes = [16, 1], strides = [1, 1]} : vector<16x128xf32> to vector<16x1xf32>
    %c0_3 = arith.constant 0 : index
    %c0_4 = arith.constant 0 : index
    %4 = vector.load %arg4[%c0_3, %c0_4] : memref<16x1xf32, #tpu.memory_space<vmem>>, vector<16x1xf32>
    tpu.vector_store %arg4[%c0_3, %c0_4], %3 {strides = array<i32>} : memref<16x1xf32, #tpu.memory_space<vmem>>, vector<16x1xf32>,
    %5 = vector.extract_strided_slice %2 {offsets = [0, 17], sizes = [16, 1], strides = [1, 1]} : vector<16x128xf32> to vector<16x1xf32>
    %c0_5 = arith.constant 0 : index
    %c0_6 = arith.constant 0 : index
    %6 = vector.load %arg5[%c0_5, %c0_6] : memref<16x1xf32, #tpu.memory_space<vmem>>, vector<16x1xf32>
    tpu.vector_store %arg5[%c0_5, %c0_6], %5 {strides = array<i32>} : memref<16x1xf32, #tpu.memory_space<vmem>>, vector<16x1xf32>,
    %7 = tpu.iota {dimensions = array<i32: 1>} : vector<16x128xi32>
    %c18_i32 = arith.constant 18 : i32
    %8 = vector.broadcast %c18_i32 : i32 to vector<16x128xi32>
    %9 = arith.cmpi eq, %7, %8 : vector<16x128xi32>
    %cst_7 = arith.constant 1.000000e+00 : f32
    %10 = vector.broadcast %cst_7 : f32 to vector<16x128xf32>
    %11 = arith.select %9, %10, %2 : vector<16x128xi1>, vector<16x128xf32>
    %12 = arith.truncf %11 : vector<16x128xf32> to vector<16x128xbf16>
    %c0_8 = arith.constant 0 : index
    %c0_9 = arith.constant 0 : index
    %13 = vector.load %arg3[%c0_8, %c0_9] : memref<16x128xbf16, #tpu.memory_space<vmem>>, vector<16x128xbf16>
    tpu.vector_store %arg3[%c0_8, %c0_9], %12 {strides = array<i32>} : memref<16x128xbf16, #tpu.memory_space<vmem>>, vector<16x128xbf16>,
    return
  }
  func.func @transform_0(%arg0: i32) -> (i32, i32) {
    %c0_i32 = arith.constant 0 : i32
    %c0_i32_0 = arith.constant 0 : i32
    return %arg0, %c0_i32 : i32, i32
  }
  func.func @transform_1(%arg0: i32) -> (i32, i32) {
    %c0_i32 = arith.constant 0 : i32
    %c0_i32_0 = arith.constant 0 : i32
    %c0_i32_1 = arith.constant 0 : i32
    return %c0_i32, %c0_i32_0 : i32, i32
  }
  func.func @transform_2(%arg0: i32) -> (i32, i32) {
    %c0_i32 = arith.constant 0 : i32
    %c0_i32_0 = arith.constant 0 : i32
    return %arg0, %c0_i32 : i32, i32
  }
  func.func @transform_3(%arg0: i32) -> (i32, i32) {
    %c0_i32 = arith.constant 0 : i32
    %c0_i32_0 = arith.constant 0 : i32
    return %arg0, %c0_i32 : i32, i32
  }
  func.func @transform_4(%arg0: i32) -> (i32, i32) {
    %c0_i32 = arith.constant 0 : i32
    %c0_i32_0 = arith.constant 0 : i32
    return %arg0, %c0_i32 : i32, i32
  }
}

</mosaic_0001>

<bundles_post_ra>
// kernel: tpu_custom_call.1
= control target key start
LH: loop header
LB: loop body
LE: loop exit
PB: predicated region body
PF: predicated region fallthrough
CT: control target
= control target key end

     0   :  { %6 = vsyncpa [#allocation3], 0  ;;  %s102_s0 = inlined_call_operand.hbm [shape: f32[8,128], index: 0, kind: input, shape index: {}]   ;;  %s103_s1 = inlined_call_operand.hbm [shape: f32[8,128], index: 1, kind: output, shape index: {}]  }
   0x1   :  { %7 = vsyncpa [#allocation4], 0  ;;  %s84_s6 = smov [#allocation2]  }
   0x2   :  { %s14_s7 = sshll.u32 %s84_s6, 4  ;;  %s15_s7 = int_to_ptr.vmem [resolvable:$true] %s14_s7 }
   0x3   :  { %s48_s8 = scalar_lea.vmem %s15_s7, 128  ;;  %p53_p1 = scmp.lt.s32.totalorder %s15_s7, %s15_s7 }
   0x4   :  { %p49_p0 = scmp.ne.s32.totalorder %s15_s7, %s48_s8  ;;  %p54_p2 = scmp.lt.s32.totalorder %s48_s8, %s48_s8 }
   0x6   :  { %p55_p3 = por %p54_p2, %p53_p1 }
   0x8   :  { %p56_p4 = pnand %p55_p3, %p49_p0 }
   0xa   :  { %59 = shalt.err (!%p56_p4)
}
   0xb   :  { %17 = dma.hbm_to_vmem [thread:$0]  %s102_s0, 128, %s15_s7, [#allocation3]  }
   0xc   :  { %80 = dma.done.wait [#allocation3], 128  }
   0xd   :  { %81 = vsyncadd [#allocation3], 4294967168  ;;  %s85_s11 = smov [#allocation5]   ;;  %v21_v0 = vld [vmem:[#allocation2] sm:$0xff] }
   0xe   :  { %s29_s12 = sshll.u32 %s85_s11, 4  ;;  %22 = vst [vmem:[#allocation5] sm:$0xff] %v21_v0  ;;  %s30_s12 = int_to_ptr.vmem [resolvable:$true] %s29_s12 }
   0xf   :  { %s60_s13 = scalar_lea.vmem %s30_s12, 128  ;;  %p65_p6 = scmp.lt.s32.totalorder %s30_s12, %s30_s12 }
  0x10   :  { %p61_p5 = scmp.ne.s32.totalorder %s30_s12, %s60_s13  ;;  %p66_p7 = scmp.lt.s32.totalorder %s60_s13, %s60_s13 }
  0x12   :  { %p67_p8 = por %p66_p7, %p65_p6 }
  0x14   :  { %p68_p9 = pnand %p67_p8, %p61_p5 }
  0x16   :  { %71 = shalt.err (!%p68_p9)
}
  0x17   :  { %32 = dma.vmem_to_hbm [thread:$0]  %s30_s12, 128, %s103_s1, [#allocation4]  }
  0x18   :  { %82 = dma.done.wait [#allocation4], 128  }
  0x19   :  { %83 = vsyncadd [#allocation4], 4294967168 }
  0x1a   :  { %36 = vsyncpa [#allocation3], 1 }
  0x1b   :  { %37 = vsyncpa [#allocation4], 1 }

// kernel: tpu_custom_call.1
= control target key start
LH: loop header
LB: loop body
LE: loop exit
PB: predicated region body
PF: predicated region fallthrough
CT: control target
= control target key end

     0   :  { %10 = vsyncpa [#allocation3], 0  ;;  %s338_s0 = inlined_call_operand.hbm [shape: bf16[16,32], index: 0, kind: input, shape index: {}]   ;;  %s339_s1 = inlined_call_operand.hbm [shape: bf16[32,128], index: 1, kind: input, shape index: {}]   ;;  %s340_s2 = inlined_call_operand.hbm [shape: bf16[16,128], index: 2, kind: output, shape index: {0}]   ;;  %s341_s3 = inlined_call_operand.vmem [shape: f32[16,1], index: 3, kind: output, shape index: {1}]   ;;  %s342_s4 = inlined_call_operand.vmem [shape: f32[16,1], index: 4, kind: output, shape index: {2}]  }
   0x1   :  { %11 = vsyncpa [#allocation6], 0 }
   0x2   :  { %12 = vsyncpa [#allocation4], 0  ;;  %s274_s15 = smov [#allocation2]  }
   0x3   :  { %s18_s16 = sshll.u32 %s274_s15, 4  ;;  %s19_s16 = int_to_ptr.vmem [resolvable:$true] %s18_s16 }
   0x4   :  { %s216_s17 = scalar_lea.vmem %s19_s16, 128  ;;  %p221_p1 = scmp.lt.s32.totalorder %s19_s16, %s19_s16 }
   0x5   :  { %p217_p0 = scmp.ne.s32.totalorder %s19_s16, %s216_s17  ;;  %p222_p2 = scmp.lt.s32.totalorder %s216_s17, %s216_s17 }
   0x7   :  { %p223_p3 = por %p222_p2, %p221_p1 }
   0x9   :  { %p224_p4 = pnand %p223_p3, %p217_p0 }
   0xb   :  { %227 = shalt.err (!%p224_p4)
}
   0xc   :  { %s275_s18 = smov 64   ;;  %s276_s19 = smov 4  }
   0xd   :  { %24 = dma.hbm_to_vmem [thread:$0]  %s338_s0, 128, %s19_s16, [#allocation3], %s275_s18, %s275_s18, %s276_s19  }
   0xe   :  { %s277_s22 = smov [#allocation5]  }
   0xf   :  { %s30_s23 = sshll.u32 %s277_s22, 4  ;;  %s31_s23 = int_to_ptr.vmem [resolvable:$true] %s30_s23 }
  0x10   :  { %s236_s24 = scalar_lea.vmem %s31_s23, 256  ;;  %p241_p6 = scmp.lt.s32.totalorder %s31_s23, %s31_s23 }
  0x11   :  { %p237_p5 = scmp.ne.s32.totalorder %s31_s23, %s236_s24  ;;  %p242_p7 = scmp.lt.s32.totalorder %s236_s24, %s236_s24 }
  0x13   :  { %p243_p8 = por %p242_p7, %p241_p6 }
  0x15   :  { %p244_p9 = pnand %p243_p8, %p237_p5 }
  0x17   :  { %247 = shalt.err (!%p244_p9)
}
  0x18   :  { %36 = dma.hbm_to_vmem [thread:$0]  %s339_s1, 256, %s31_s23, [#allocation6], %s275_s18, %s275_s18, %s276_s19  }
  0x19   :  { %268 = dma.done.wait [#allocation3], 128  }
  0x1a   :  { %269 = vsyncadd [#allocation3], 4294967168 }
  0x1b   :  { %270 = dma.done.wait [#allocation6], 256  }
  0x1c   :  { %271 = vsyncadd [#allocation6], 4294967040  ;;  %v278_v0 = vmov 0.0   ;;  %vm279_vm0 = vmmov 0   ;;  %v205_v1 = vld [vmem:[#allocation5 + $0x8] sm:$0xff]   ;;  %v206_v2 = vld [vmem:[#allocation5] sm:$0xff]   ;;  %v131_v4 = vlaneseq }
  0x1d   :  { %188 = vmatprep.subr.bf16.mxu0 %v278_v0  ;;  %192 = vmatprep.mubr.msk.bf16.mxu0 %vm279_vm0, %v278_v0  ;;  %v207_v3 = vld [vmem:[#allocation2] sm:$0xff]   ;;  %vm67_vm1 = vcmask 261120   ;;  %s280_s0 = smov 111   ;;  %s281_s1 = smov 112  }
  0x1e   :  { %189 = vmatpush3.bf16.msra.mxu0 %v205_v1  ;;  %v132_v5 = vand.u32 127, %v131_v4  ;;  %s282_s27 = smov [#allocation7]  }
  0x1f   :  { %190 = vmatprep.subr.bf16.mxu0 %v278_v0  ;;  %s151_s28 = sshll.u32 %s282_s27, 4  ;;  %s152_s28 = int_to_ptr.vmem [resolvable:$true] %s151_s28 }
  0x20   :  { %vm133_vm2 = vcmp.eq.s32.totalorder %v132_v5, 18  ;;  %s248_s29 = scalar_lea.vmem %s152_s28, 128  ;;  %p253_p11 = scmp.lt.s32.totalorder %s152_s28, %s152_s28 }
  0x21   :  { %p249_p10 = scmp.ne.s32.totalorder %s152_s28, %s248_s29  ;;  %p254_p12 = scmp.lt.s32.totalorder %s248_s29, %s248_s29 }
  0x22   :  { %191 = vmatpush3.bf16.msra.mxu0 %v206_v2 }
  0x23   :  { %p255_p13 = por %p254_p12, %p253_p11 }
  0x25   :  { %193 = vmatmul.mubr.msk.bf16.vlgmr.msra.gmra.mxu0 %vm67_vm1, %v207_v3  ;;  %p256_p0 = pnand %p255_p13, %p249_p10 }
  0xe5   :  { %v105_v6 = vpop.f32.mrf.mxu0 }
  0xe6   :  { %123 = vrot.lane.b32.xlu1 %v105_v6, %s280_s0  ;;  %114 = vrot.lane.b32.xlu0 %v105_v6, %s281_s1  ;;  %v134_v9 = vsel %vm133_vm2, 1.0, %v105_v6 }
  0xe7   :  { %v194_v7 = vpop.f32.mrf.mxu0 }
  0xe9   :  { %v108_v8 = vpop.f32.mrf.mxu0 }
  0xea   :  { %v135_v10 = vsel %vm133_vm2, 1.0, %v108_v8  ;;  %125 = vrot.lane.b32.xlu1 %v108_v8, %s280_s0  ;;  %116 = vrot.lane.b32.xlu0 %v108_v8, %s281_s1 }
  0xeb   :  { %v195_v11 = vpop.f32.mrf.mxu0  ;;  %v183_v12 = vpack.c.bf16 %v135_v10, %v134_v9 }
  0xed   :  { %184 = vst [vmem:[#allocation7] sm:$0xff] %v183_v12  }
  0xee   :  { %259 = shalt.err (!%p256_p0)
}
  0xef   :  { %157 = dma.vmem_to_hbm [thread:$0]  %s152_s28, 128, %s340_s2, [#allocation4], %s275_s18, %s275_s18, %s276_s19   ;;  %vm120_vm3 = vcmask 7168  }
 0x158   :  { %v124_v13 = vpop.permute.xlu1 %123  ;;  %v115_v14 = vpop.permute.xlu0 %114 }
 0x159   :  { %129 = vst.msk [vmem:[%s342_s4] sm:$0xff] %vm120_vm3, %v124_v13  ;;  %121 = vst.msk [vmem:[%s341_s3] sm:$0xff] %vm120_vm3, %v115_v14 }
 0x15c   :  { %v126_v15 = vpop.permute.xlu1 %125  ;;  %v117_v16 = vpop.permute.xlu0 %116 }
 0x15d   :  { %130 = vst.msk [vmem:[%s342_s4 + $0x8] sm:$0xff] %vm120_vm3, %v126_v15  ;;  %122 = vst.msk [vmem:[%s341_s3 + $0x8] sm:$0xff] %vm120_vm3, %v117_v16 }
 0x15e   :  { %272 = dma.done.wait [#allocation4], 128  }
 0x15f   :  { %273 = vsyncadd [#allocation4], 4294967168 }
 0x160   :  { %169 = vsyncpa [#allocation3], 1 }
 0x161   :  { %170 = vsyncpa [#allocation6], 1 }
 0x162   :  { %171 = vsyncpa [#allocation4], 1 }

</bundles_post_ra>
